<compile_context>
chip_gen: v7x
topology: tpu7x:2x2x1
jax: 0.10.0
libtpu: 0.0.40
codegen_flags: <defaults>
</compile_context>

<pallas_src>
import functools

import jax
import jax.numpy as jnp
from jax.experimental import pallas as pl
from jax.experimental.pallas import tpu as pltpu


# Constant (16, 4) matrix: gate_i(a, b) = G[i,0] + G[i,1]*a + G[i,2]*b + G[i,3]*a*b
_GATE_BASIS = (
    (0.0, 0.0, 0.0, 0.0),    # 0:  False
    (0.0, 0.0, 0.0, 1.0),    # 1:  a AND b
    (0.0, 1.0, 0.0, -1.0),   # 2:  a AND NOT b
    (0.0, 1.0, 0.0, 0.0),    # 3:  a
    (0.0, 0.0, 1.0, -1.0),   # 4:  NOT a AND b
    (0.0, 0.0, 1.0, 0.0),    # 5:  b
    (0.0, 1.0, 1.0, -2.0),   # 6:  a XOR b
    (0.0, 1.0, 1.0, -1.0),   # 7:  a OR b
    (1.0, -1.0, -1.0, 1.0),  # 8:  NOR
    (1.0, -1.0, -1.0, 2.0),  # 9:  XNOR
    (1.0, 0.0, -1.0, 0.0),   # 10: NOT b
    (1.0, 0.0, -1.0, 1.0),   # 11: a OR NOT b
    (1.0, -1.0, 0.0, 0.0),   # 12: NOT a
    (1.0, -1.0, 0.0, 1.0),   # 13: NOT a OR b
    (1.0, 0.0, 0.0, -1.0),   # 14: NAND
    (1.0, 0.0, 0.0, 0.0),    # 15: True
)

_LANE_TILE_CAP = 2048        # 2 MiB f32 block at TR=256 -> ~12 MiB pipeline
_ROW_TILE_CAP = 256
_VMEM_LIMIT_BYTES = 32 * 1024 * 1024   # <= physical VMEM on v5e/v6e/v7x


def _treelogic_kernel(c_ref, a_ref, b_ref, y_ref):
    """y = c0 + c1*a + c2*b + c3*(a*b), coefficients broadcast per row."""
    a = a_ref[...]
    b = b_ref[...]
    c0 = c_ref[:, 0:1]
    c1 = c_ref[:, 1:2]
    c2 = c_ref[:, 2:3]
    c3 = c_ref[:, 3:4]
    y_ref[...] = c0 + c2 * b + a * (c1 + c3 * b)


def _largest_divisor_tile(size, unit, cap):
    """Largest multiple of `unit` that divides `size`, capped at `cap` (None if none)."""
    best = None
    t = unit
    top = min(size, cap)
    while t <= top:
        if size % t == 0:
            best = t
        t += unit
    return best


def _pick_row_tile(R):
    """Sublane-dim tile for the (R, 4) coefficients / (R, 2M) data rows."""
    tr = _largest_divisor_tile(R, 8, _ROW_TILE_CAP)
    if tr is not None:
        return tr, R                         # exact divisor, no padding
    if R <= _ROW_TILE_CAP:
        return R, R                          # full-extent block is always legal
    Rp = pl.cdiv(R, 8) * 8                   # last resort: pad a few rows
    return _largest_divisor_tile(Rp, 8, _ROW_TILE_CAP), Rp


def _pick_lane_tile(M):
    """Lane-dim tile. Must be a multiple of 128 (the [a|b] view is 2*M wide)."""
    cap = _LANE_TILE_CAP
    if M % 128 == 0:
        tm = _largest_divisor_tile(M, 128, cap)
        if tm >= 512 or tm == M:             # big tile, no padding
            return tm, M
        if M <= 2 * cap:                     # awkward M: one full-width block still fits VMEM
            return M, M
    # Last resort: pad up to one LARGE tile (never fall back to 128-lane tiles).
    tm = min(cap, pl.cdiv(M, 128) * 128)
    return tm, pl.cdiv(M, tm) * tm


def _fold_gate_coefficients(weights, training, out_dtype):
    """softmax / one-hot over the 16 gates, folded into 4 coefficients per row."""
    C, Dh, _ = weights.shape
    if training:
        w_prob = jax.nn.softmax(weights.astype(jnp.float32), axis=-1)
    else:
        idx = jnp.argmax(weights, axis=-1)
        w_prob = jax.nn.one_hot(idx, 16, dtype=jnp.float32)
    G = jnp.asarray(_GATE_BASIS, dtype=jnp.float32)              # (16, 4)
    return (w_prob.reshape(C * Dh, 16) @ G).astype(out_dtype)    # (R, 4)


def _treelogic_rm_impl(x_rm, weights, training=True):
    """Core kernel in channel/gate-major layout.

    x_rm:    (C*D, M) with rows ordered (c, d), d fastest; M = N*H*W
    weights: (C, D//2, 16) gate logits
    returns: (C*(D//2), M)
    """
    C, Dh, _ = weights.shape
    D = 2 * Dh
    R = C * Dh
    CD, M = x_rm.shape
    assert CD == C * D, (CD, C, D)

    coef = _fold_gate_coefficients(weights, training, x_rm.dtype)  # (R, 4)

    TR, Rp = _pick_row_tile(R)
    TM, Mp = _pick_lane_tile(M)

    # Megacore (v7x has 2 TensorCores): make sure there are >=2 parallel blocks,
    # preferring a split along the row axis so each core's coef block stays resident.
    if (Rp // TR) * (Mp // TM) < 2:
        if TR % 16 == 0:
            TR //= 2
        elif TM % 256 == 0:
            TM //= 2

    # Padding only as a last resort (each pad is an extra full HBM pass).
    x2 = x_rm
    if Mp != M:
        x2 = jnp.pad(x2, ((0, 0), (0, Mp - M)))
    # Free (metadata-only) reshape: row k of x3 is [a_k (Mp cols) | b_k (Mp cols)].
    x3 = x2.reshape(R, 2 * Mp)
    if Rp != R:
        x3 = jnp.pad(x3, ((0, Rp - R), (0, 0)))
        coef = jnp.pad(coef, ((0, Rp - R), (0, 0)))

    ni = Rp // TR
    nj = Mp // TM
    grid = (ni, nj)
    elem_bytes = jnp.dtype(x_rm.dtype).itemsize

    y2 = pl.pallas_call(
        _treelogic_kernel,
        out_shape=jax.ShapeDtypeStruct((Rp, Mp), x_rm.dtype),
        grid_spec=pltpu.PrefetchScalarGridSpec(
            num_scalar_prefetch=0,
            grid=grid,
            in_specs=[
                pl.BlockSpec((TR, 4), lambda i, j: (i, 0)),          # folded gate coeffs
                pl.BlockSpec((TR, TM), lambda i, j: (i, j)),         # a window of x3
                pl.BlockSpec((TR, TM), lambda i, j: (i, j + nj)),    # b window of x3
            ],
            out_specs=pl.BlockSpec((TR, TM), lambda i, j: (i, j)),
        ),
        compiler_params=pltpu.CompilerParams(
            dimension_semantics=("parallel", "parallel"),
            vmem_limit_bytes=_VMEM_LIMIT_BYTES),
        cost_estimate=pl.CostEstimate(
            flops=5 * Rp * Mp,
            transcendentals=0,
            bytes_accessed=3 * Rp * Mp * elem_bytes + Rp * 4 * elem_bytes),
    )(coef, x3, x3)

    if Rp != R or Mp != M:
        y2 = y2[:R, :M]
    return y2


# (R, M)-layout entry point: stacked TreeLogic layers should use this directly so
# the channel/gate-major layout is kept between layers (no transpose HBM passes).
treelogic_forward_rm = jax.jit(_treelogic_rm_impl, static_argnames=("training",))


@functools.partial(jax.jit, static_argnames=("training",))
def treelogic_forward(x, weights, training=True):
    """Pallas version of TreeLogicLayer.forward (semantics of forward_python).

    x:       (N, C, H, W, D) float32, D = input_bits (even)
    weights: (C, D//2, 16)   float32 gate logits
    returns: (N, C, H, W, D//2)
    """
    N, C, H, W, D = x.shape
    assert D % 2 == 0
    Dh = D // 2
    assert weights.shape == (C, Dh, 16)
    M = N * H * W

    # Boundary relayout only (use treelogic_forward_rm to avoid it inside a stack).
    x_rm = jnp.transpose(x, (1, 4, 0, 2, 3)).reshape(C * D, M)
    y_rm = _treelogic_rm_impl(x_rm, weights, training=training)     # (C*Dh, M)
    return y_rm.reshape(C, Dh, N, H, W).transpose(2, 0, 3, 4, 1)    # (N, C, H, W, Dh)


def treelogic_reference(x, weights, training=True):
    """Pure-JAX port of TreeLogicLayer.forward_python (bin_op_s over 16 gates)."""
    _, C, _, _, D = x.shape
    Dh = D // 2
    if training:
        w_prob = jax.nn.softmax(weights.astype(jnp.float32), axis=-1)
    else:
        idx = jnp.argmax(weights, axis=-1)
        w_prob = jax.nn.one_hot(idx, 16, dtype=x.dtype)
    a = x[..., 0::2]
    b = x[..., 1::2]
    ab = a * b
    one = jnp.ones_like(a)
    zero = jnp.zeros_like(a)
    gates = jnp.stack([
        zero, ab, a - ab, a, b - ab, b,
        a + b - 2.0 * ab, a + b - ab,
        one - (a + b - ab), one - (a + b - 2.0 * ab),
        one - b, one - b + ab, one - a, one - a + ab,
        one - ab, one,
    ], axis=-1)                                           # (N,C,H,W,Dh,16)
    wp = w_prob.reshape(1, C, 1, 1, Dh, 16).astype(x.dtype)
    return jnp.sum(gates * wp, axis=-1)


if __name__ == "__main__":
    # small shapes consistent with the module's 5-D input convention
    N, C, H, W = 2, 4, 16, 16
    input_bits = 8                 # D (even) -> out_bits = 4
    Dh = input_bits // 2

    key = jax.random.PRNGKey(0)
    kx, kw = jax.random.split(key)
    # logic inputs are soft bits in [0, 1]
    x = jax.random.uniform(kx, (N, C, H, W, input_bits), dtype=jnp.float32)
    # deterministic weight init matching nn.Parameter(torch.randn(C, out_bits, 16))
    weights = jax.random.normal(kw, (C, Dh, 16), dtype=jnp.float32)

    # training path (softmax over gates)
    y = jax.block_until_ready(treelogic_forward(x, weights, training=True))
    y_ref = treelogic_reference(x, weights, training=True)
    assert y.shape == (N, C, H, W, Dh), y.shape
    assert jnp.allclose(y, y_ref, atol=1e-5, rtol=1e-5), (
        float(jnp.max(jnp.abs(y - y_ref))))

    # eval path (one-hot argmax over gates)
    # NOTE: jnp.argmax and torch.argmax both take the first index on ties.
    y_eval = jax.block_until_ready(treelogic_forward(x, weights, training=False))
    y_eval_ref = treelogic_reference(x, weights, training=False)
    assert jnp.allclose(y_eval, y_eval_ref, atol=1e-5, rtol=1e-5), (
        float(jnp.max(jnp.abs(y_eval - y_eval_ref))))

    # TODO(synk): backward pass (TreeLogicFunction.backward) and grad_factor
    # gradient scaling are not implemented; forward-only kernel.
    print("KERNEL_OK")
</pallas_src>

<mosaic_0001>
module attributes {stable_mosaic.version = 11 : i64} {
  func.func @_treelogic_kernel(%arg0: i32, %arg1: i32, %arg2: memref<8x4xf32, #tpu.memory_space<vmem>>, %arg3: memref<8x512xf32, #tpu.memory_space<vmem>>, %arg4: memref<8x512xf32, #tpu.memory_space<vmem>>, %arg5: memref<8x512xf32, #tpu.memory_space<vmem>>) attributes {dimension_semantics = [#tpu.dimension_semantics<parallel>, #tpu.dimension_semantics<parallel>], iteration_bounds = array<i64: 2, 1>, scalar_prefetch = 0 : i64, scratch_operands = 0 : i64, tpu.core_type = #tpu.core_type<tc>, window_params = [{transform_indices = @transform_0, window_bounds = array<i64: 8, 4>}, {transform_indices = @transform_1, window_bounds = array<i64: 8, 512>}, {transform_indices = @transform_2, window_bounds = array<i64: 8, 512>}, {transform_indices = @transform_3, window_bounds = array<i64: 8, 512>}]} {
    %c0 = arith.constant 0 : index
    %c0_0 = arith.constant 0 : index
    %0 = vector.load %arg3[%c0, %c0_0] : memref<8x512xf32, #tpu.memory_space<vmem>>, vector<8x512xf32>
    %c0_1 = arith.constant 0 : index
    %c0_2 = arith.constant 0 : index
    %1 = vector.load %arg4[%c0_1, %c0_2] : memref<8x512xf32, #tpu.memory_space<vmem>>, vector<8x512xf32>
    %c0_3 = arith.constant 0 : index
    %c0_4 = arith.constant 0 : index
    %2 = vector.load %arg2[%c0_3, %c0_4] : memref<8x4xf32, #tpu.memory_space<vmem>>, vector<8x1xf32>
    %c0_5 = arith.constant 0 : index
    %c1 = arith.constant 1 : index
    %3 = vector.load %arg2[%c0_5, %c1] : memref<8x4xf32, #tpu.memory_space<vmem>>, vector<8x1xf32>
    %c0_6 = arith.constant 0 : index
    %c2 = arith.constant 2 : index
    %4 = vector.load %arg2[%c0_6, %c2] : memref<8x4xf32, #tpu.memory_space<vmem>>, vector<8x1xf32>
    %c0_7 = arith.constant 0 : index
    %c3 = arith.constant 3 : index
    %5 = vector.load %arg2[%c0_7, %c3] : memref<8x4xf32, #tpu.memory_space<vmem>>, vector<8x1xf32>
    %6 = vector.broadcast %4 : vector<8x1xf32> to vector<8x512xf32>
    %7 = arith.mulf %6, %1 : vector<8x512xf32>
    %8 = vector.broadcast %2 : vector<8x1xf32> to vector<8x512xf32>
    %9 = arith.addf %8, %7 : vector<8x512xf32>
    %10 = vector.broadcast %5 : vector<8x1xf32> to vector<8x512xf32>
    %11 = arith.mulf %10, %1 : vector<8x512xf32>
    %12 = vector.broadcast %3 : vector<8x1xf32> to vector<8x512xf32>
    %13 = arith.addf %12, %11 : vector<8x512xf32>
    %14 = arith.mulf %0, %13 : vector<8x512xf32>
    %15 = arith.addf %9, %14 : vector<8x512xf32>
    %c0_8 = arith.constant 0 : index
    %c0_9 = arith.constant 0 : index
    %16 = vector.load %arg5[%c0_8, %c0_9] : memref<8x512xf32, #tpu.memory_space<vmem>>, vector<8x512xf32>
    tpu.vector_store %arg5[%c0_8, %c0_9], %15 {strides = array<i32>} : memref<8x512xf32, #tpu.memory_space<vmem>>, vector<8x512xf32>,
    return
  }
  func.func @transform_0(%arg0: i32, %arg1: i32) -> (i32, i32) {
    %c0_i32 = arith.constant 0 : i32
    %c0_i32_0 = arith.constant 0 : i32
    return %arg0, %c0_i32 : i32, i32
  }
  func.func @transform_1(%arg0: i32, %arg1: i32) -> (i32, i32) {
    %c0_i32 = arith.constant 0 : i32
    return %arg0, %arg1 : i32, i32
  }
  func.func @transform_2(%arg0: i32, %arg1: i32) -> (i32, i32) {
    %c1_i32 = arith.constant 1 : i32
    %0 = arith.addi %arg1, %c1_i32 : i32
    %c0_i32 = arith.constant 0 : i32
    return %arg0, %0 : i32, i32
  }
  func.func @transform_3(%arg0: i32, %arg1: i32) -> (i32, i32) {
    %c0_i32 = arith.constant 0 : i32
    return %arg0, %arg1 : i32, i32
  }
}

</mosaic_0001>

<bundles_post_ra>
// kernel: treelogic_forward.1
= control target key start
LH: loop header
LB: loop body
LE: loop exit
PB: predicated region body
PF: predicated region fallthrough
CT: control target
= control target key end

     0   :  { %s541_s12 = smov 0   ;;  %s543_s13 = smov 0   ;;  %s585_s0 = inlined_call_operand.vmem [shape: f32[16,4], index: 0, kind: input, shape index: {}]   ;;  %s586_s1 = inlined_call_operand.vmem [shape: f32[16,1024], index: 1, kind: input, shape index: {}, may-alias: {1,2}]   ;;  %s587_s2 = inlined_call_operand.vmem [shape: f32[16,1024], index: 2, kind: input, shape index: {}, may-alias: {1,2}]   ;;  %s588_s3 = inlined_call_operand.vmem [shape: f32[16,512], index: 3, kind: output, shape index: {}]  }
   0x1   :  { %s545_s14 = smov 0  }
   0x2 LB: > { %s25_s15 = sadd.s32 1, %s511_s13  ;;  %p445_p0 = scmp.ge.s32.totalorder %s515_s14, 1  ;;  %s515_s14 = sphi %s545_s14, %s13_s14   ;;  %s511_s13 = sphi %s543_s13, %s590_s13   ;;  %s507_s12 = sphi %s541_s12, %s589_s12  }
   0x3   : > { %p27_p1 = scmp.ge.s32.totalorder %s25_s15, 2  ;;  %p188_p2 = scmp.lt.s32.totalorder %s515_s14, 3 }
   0x5   : > { %s592_s15 = smov (%p27_p1, %s25_s15), 0  ;;  %p189_p3 = pnand %p445_p0, %p188_p2 }
   0x6   : > { %p234_p4 = scmp.lt.s32.totalorder (!%p189_p3), %s507_s12, 1  ;;  %v517_v0 = vmov (!%p189_p3), 3   ;;  %v518_v1 = vmov (!%p189_p3), 1   ;;  %v519_v3 = vmov (!%p189_p3), 2   ;;  %v520_v4 = vmov (!%p189_p3), 0  }
   0x7   : > { %192 = sbr.rel (%p189_p3) target bundleno = 159 (0x9f), region = 32  ;;  %488 = vset.pattern.permute.xlu0 (!%p189_p3), %v517_v0  ;;  %490 = vset.pattern.permute.xlu1 (!%p189_p3), %v518_v1 }
   0xe   : > { %s594_s12 = smov (!%p234_p4, %s507_s12), 1 }
   0xf   : > { %s446_s16 = sshll.u32 %s594_s12, 3  ;;  %s455_s20 = sshll.u32 %s594_s12, 6 }
  0x10   : > { %s237_s19 = scalar_lea.vmem %s585_s0, %s446_s16  ;;  %s457_s21 = sadd.s32 32, %s455_s20 }
  0x11   : > { %v278_v2 = vld [vmem:[%s237_s19] sm:$0xff]  ;;  %s257_s24 = scalar_lea.vmem %s587_s2, %s457_s21  ;;  %s246_s27 = scalar_lea.vmem %s586_s1, %s455_s20 }
  0x12   : > { %297 = vperm.xlu0 %488, %v278_v2   ;;  %305 = vperm.xlu1 %490, %v278_v2   ;;  %v274_v5 = vld [vmem:[%s257_s24] sm:$0xff]  ;;  %v275_v6 = vld [vmem:[%s257_s24 + $0x8] sm:$0xff]  ;;  %v276_v7 = vld [vmem:[%s257_s24 + $0x10] sm:$0xff]  ;;  %s458_s28 = sshll.u32 %s594_s12, 5 }
  0x13   : > { %v277_v8 = vld [vmem:[%s257_s24 + $0x18] sm:$0xff]  ;;  %v270_v19 = vld [vmem:[%s246_s27] sm:$0xff]  ;;  %v271_v20 = vld [vmem:[%s246_s27 + $0x8] sm:$0xff]  ;;  %s268_s4 = scalar_lea.vmem %s588_s3, %s458_s28 }
  0x14   : > { %v272_v21 = vld [vmem:[%s246_s27 + $0x10] sm:$0xff]  ;;  %v273_v22 = vld [vmem:[%s246_s27 + $0x18] sm:$0xff] }
  0x16   : > { %489 = vset.pattern.permute.xlu0 %v519_v3  ;;  %491 = vset.pattern.permute.xlu1 %v520_v4 }
  0x17   : > { %281 = vperm.xlu0 %489, %v278_v2   ;;  %289 = vperm.xlu1 %491, %v278_v2  }
  0x1b   : > { %492 = vset.pattern.permute.xlu0 %v518_v1 }
  0x91   : > { %v298_v9 = vpop.permute.xlu0 %297  ;;  %v306_v10 = vpop.permute.xlu1 %305 }
  0x92   : > { %v300_v11 = vmul.f32 %v298_v9, %v274_v5  ;;  %v301_v12 = vmul.f32 %v298_v9, %v275_v6  ;;  %v302_v13 = vmul.f32 %v298_v9, %v276_v7  ;;  %v303_v14 = vmul.f32 %v298_v9, %v277_v8 }
  0x94   : > { %v308_v15 = vadd.f32 %v306_v10, %v300_v11  ;;  %v309_v16 = vadd.f32 %v306_v10, %v301_v12  ;;  %v310_v17 = vadd.f32 %v306_v10, %v302_v13  ;;  %v311_v18 = vadd.f32 %v306_v10, %v303_v14 }
  0x96   : > { %v282_v23 = vpop.permute.xlu0 %281  ;;  %v290_v24 = vpop.permute.xlu1 %289  ;;  %v312_v29 = vmul.f32 %v308_v15, %v270_v19  ;;  %v313_v30 = vmul.f32 %v309_v16, %v271_v20  ;;  %v314_v31 = vmul.f32 %v310_v17, %v272_v21  ;;  %v315_v32 = vmul.f32 %v311_v18, %v273_v22 }
  0x97   : > { %v284_v25 = vmul.f32 %v282_v23, %v274_v5  ;;  %v285_v26 = vmul.f32 %v282_v23, %v275_v6  ;;  %v286_v27 = vmul.f32 %v282_v23, %v276_v7  ;;  %v287_v28 = vmul.f32 %v282_v23, %v277_v8 }
  0x99   : > { %v292_v33 = vadd.f32 %v290_v24, %v284_v25  ;;  %v293_v34 = vadd.f32 %v290_v24, %v285_v26  ;;  %v294_v35 = vadd.f32 %v290_v24, %v286_v27  ;;  %v295_v36 = vadd.f32 %v290_v24, %v287_v28 }
  0x9b   : > { %v316_v37 = vadd.f32 %v312_v29, %v292_v33  ;;  %v317_v38 = vadd.f32 %v313_v30, %v293_v34  ;;  %v318_v39 = vadd.f32 %v314_v31, %v294_v35  ;;  %v319_v40 = vadd.f32 %v315_v32, %v295_v36 }
  0x9d   : > { %320 = vst [vmem:[%s268_s4] sm:$0xff] %v316_v37  ;;  %321 = vst [vmem:[%s268_s4 + $0x8] sm:$0xff] %v317_v38 }
  0x9e   : > { %322 = vst [vmem:[%s268_s4 + $0x10] sm:$0xff] %v318_v39  ;;  %323 = vst [vmem:[%s268_s4 + $0x18] sm:$0xff] %v319_v40 }
  0x9f PF: > { %s13_s14 = sadd.s32 1, %s515_s14   ;;  %s589_s12 = smov %s511_s13 }
  0xa0   : > { %p10_p5 = scmp.ge.s32.totalorder %s13_s14, 4   ;;  %s590_s13 = smov %s592_s15 }
  0xa2   :  { %12 = sbr.rel (!%p10_p5) target bundleno = 2 (0x2), region = 68 }

</bundles_post_ra>
